<compile_context>
chip_gen: v6e
topology: v6e:2x2x1
jax: 0.10.0
libtpu: 0.0.40
codegen_flags: <defaults>
</compile_context>

<pallas_src>
import functools

import jax
import jax.numpy as jnp
from jax import lax
from jax.experimental import pallas as pl
from jax.experimental.pallas import tpu as pltpu

EPS = 1e-5
LANE = 128


def _geom(N, H, W):
    """Static geometry of the lane-aligned flat padded layout."""
    H2, W2 = H // 2, W // 2
    Wp = W2 + 2                                    # padded row width
    Praw = (H2 + 2) * Wp                           # used positions per sample
    Ppad = -(-Praw // LANE) * LANE                 # lane-aligned segment per sample
    NP = N * Ppad                                  # lane-dense flat output length
    G = LANE                                       # guard band (>= max |tap| = Wp+1)
    L = NP + 2 * G                                 # staging slab length
    return H2, W2, Wp, Praw, Ppad, NP, G, L


def _down_kernel(x_ref, sel_ref, mask_ref, w_ref, par_ref, out_ref,
                 a1_ref, a2_ref, t_ref, *, N, H, W, Cinpad, Cout):
    H2, W2, Wp, Praw, Ppad, NP, G, L = _geom(N, H, W)
    HW = H * W
    K1, K2 = 9 * Cinpad, 9 * Cout
    offs = [(dy - 1) * Wp + (dx - 1) for dy in range(3) for dx in range(3)]
    inv_count = 1.0 / float(N * H2 * W2)

    mask = mask_ref[...]                           # (1, NP): 1.0 at valid positions
    sel = sel_ref[...]                             # (HW, Ppad): 0/1 pool-scatter matrix

    def bn_relu(z, g, b):
        # Training-mode BN over valid positions only (single-pass stats),
        # folded into a per-channel scale/shift, then ReLU.
        zm = z * mask
        mean = jnp.sum(zm, axis=1, keepdims=True) * inv_count
        ex2 = jnp.sum(zm * z, axis=1, keepdims=True) * inv_count
        var = ex2 - mean * mean
        s = g * lax.rsqrt(var + EPS)
        sh = b - mean * s
        return jnp.maximum(z * s + sh, 0.0)

    # ---- stage 1: 2x2/2 max pool -> bf16 zero-haloed padded slab ------------
    zg_in = jnp.zeros((Cinpad, G), jnp.bfloat16)
    a1_ref[:, pl.ds(0, G)] = zg_in                 # lower guard (lane-dense store)
    a1_ref[:, pl.ds(G + NP, G)] = zg_in            # upper guard
    for n in range(N):                             # N tiny, fully lane-dense bodies
        base = n * HW
        m = jnp.maximum(
            jnp.maximum(x_ref[:, pl.ds(base, HW)],
                        x_ref[:, pl.ds(base + 1, HW)]),
            jnp.maximum(x_ref[:, pl.ds(base + W, HW)],
                        x_ref[:, pl.ds(base + W + 1, HW)]))
        # 0/1 selection matmul: picks even (h,w) window-maxima and scatters
        # them to padded slab positions; halo rows/cols/pad tail stay zero.
        pooled = jnp.dot(m.astype(jnp.bfloat16), sel,
                         preferred_element_type=jnp.float32)     # (Cinpad, Ppad)
        a1_ref[:, pl.ds(G + n * Ppad, Ppad)] = pooled.astype(jnp.bfloat16)

    # ---- conv1: bf16 im2col taps -> single MXU matmul -> BN1 -> ReLU --------
    for ti, k in enumerate(offs):
        t_ref[pl.ds(ti * Cinpad, Cinpad), :] = a1_ref[:, pl.ds(G + k, NP)]
    z1 = jnp.dot(w_ref[pl.ds(0, Cout), pl.ds(0, K1)],
                 t_ref[pl.ds(0, K1), :],
                 preferred_element_type=jnp.float32)             # (Cout, NP)
    h1 = bn_relu(z1, par_ref[:, 0:1], par_ref[:, 1:2]) * mask    # zero halo for conv2

    # ---- conv2 input slab (guards only: h1 already carries its zero halo) ---
    zg_out = jnp.zeros((Cout, G), jnp.bfloat16)
    a2_ref[:, pl.ds(0, G)] = zg_out
    a2_ref[:, pl.ds(G + NP, G)] = zg_out
    a2_ref[:, pl.ds(G, NP)] = h1.astype(jnp.bfloat16)

    # ---- conv2 -> BN2 -> ReLU (no trailing mask: BN3 masks its own stats) ---
    for ti, k in enumerate(offs):
        t_ref[pl.ds(ti * Cout, Cout), :] = a2_ref[:, pl.ds(G + k, NP)]
    z2 = jnp.dot(w_ref[pl.ds(Cout, Cout), pl.ds(0, K2)],
                 t_ref[pl.ds(0, K2), :],
                 preferred_element_type=jnp.float32)
    h2 = bn_relu(z2, par_ref[:, 2:3], par_ref[:, 3:4])

    # ---- BN3 -> outer ReLU; halo lanes are garbage but sliced by the wrapper
    out_ref[...] = bn_relu(h2, par_ref[:, 4:5], par_ref[:, 5:6])


@jax.jit
def down_forward(x_nchw, w1, b1, g1, be1, w2, b2, g2, be2, g3, be3):
    # b1/b2 (conv biases) are exactly cancelled by the following training-mode
    # BN, so they are not sent to the kernel at all.
    del b1, b2
    N, Cin, H, W = x_nchw.shape
    Cout = w1.shape[0]
    H2, W2, Wp, Praw, Ppad, NP, G, L = _geom(N, H, W)
    assert G >= Wp + 1
    Cinpad = -(-Cin // 8) * 8
    HW = H * W
    K1, K2 = 9 * Cinpad, 9 * Cout
    Kw = max(K1, K2)

    # Input: channel-major flat layout, zero-padded channels and a lane tail
    # big enough for the shifted pooling views (base + W + 1).
    NHWpad = -(-(N * HW + W + 1) // LANE) * LANE
    xf = jnp.transpose(x_nchw, (1, 0, 2, 3)).reshape(Cin, N * HW)
    xf = jnp.pad(xf, ((0, Cinpad - Cin), (0, NHWpad - N * HW)))

    # Per-sample pooling selection matrix: flat (h, w) -> padded slab position.
    # Only even (h, w) rows select anything; everything else (halo rows/cols and
    # the pad tail of each segment) ends up exactly zero.
    src = jnp.arange(HW)
    sh, sw = src // W, src % W
    valid = (sh % 2 == 0) & (sw % 2 == 0)
    dst = jnp.where(valid, (sh // 2 + 1) * Wp + (sw // 2 + 1), -1)
    sel = (dst[:, None] == jnp.arange(Ppad)[None, :]).astype(jnp.bfloat16)

    # Valid-output-position mask over the lane-dense flat axis.
    p = jnp.arange(NP) % Ppad
    r, c = p // Wp, p % Wp
    mask = ((r >= 1) & (r <= H2) & (c >= 1) & (c <= W2)).astype(jnp.float32)[None, :]

    # OIHW conv weights -> one packed (2*Cout, Kw) bf16 im2col weight matrix.
    w1_f = jnp.pad(jnp.transpose(w1, (0, 2, 3, 1)),
                   ((0, 0), (0, 0), (0, 0), (0, Cinpad - Cin))).reshape(Cout, K1)
    w2_f = jnp.transpose(w2, (0, 2, 3, 1)).reshape(Cout, K2)
    w_packed = jnp.zeros((2 * Cout, Kw), jnp.bfloat16)
    w_packed = w_packed.at[:Cout, :K1].set(w1_f.astype(jnp.bfloat16))
    w_packed = w_packed.at[Cout:, :K2].set(w2_f.astype(jnp.bfloat16))

    # All per-channel BN parameters as one small input (one DMA instead of six).
    par = jnp.stack([g1, be1, g2, be2, g3, be3], axis=1).astype(jnp.float32)

    kernel = functools.partial(_down_kernel, N=N, H=H, W=W,
                               Cinpad=Cinpad, Cout=Cout)
    vmem = pl.BlockSpec(memory_space=pltpu.MemorySpace.VMEM)
    out_flat = pl.pallas_call(
        kernel,
        out_shape=jax.ShapeDtypeStruct((Cout, NP), jnp.float32),
        in_specs=[vmem] * 5,
        out_specs=vmem,
        scratch_shapes=[
            pltpu.VMEM((Cinpad, L), jnp.bfloat16),      # pooled + padded input slab
            pltpu.VMEM((Cout, L), jnp.bfloat16),        # conv1 activation slab
            pltpu.VMEM((Kw, NP), jnp.bfloat16),         # im2col tap matrix (both convs)
        ],
    )(xf, sel, mask, w_packed, par)

    # (Cout, N*Ppad) -> NCHW: drop the halo / pad tail and swap N/Cout.
    out = out_flat.reshape(Cout, N, Ppad)[:, :, :Praw]
    out = out.reshape(Cout, N, H2 + 2, Wp)[:, :, 1:H2 + 1, 1:W2 + 1]
    return jnp.transpose(out, (1, 0, 2, 3))


def down_reference(x_nchw, w1, b1, g1, be1, w2, b2, g2, be2, g3, be3):
    """Pure-JAX reference mirroring the PyTorch training-mode forward.
    Conv inputs are cast to bf16 with f32 accumulation to match the kernel's
    MXU precision; all BN / elementwise math stays in f32."""
    N, C, H, W = x_nchw.shape
    x = jnp.max(x_nchw.reshape(N, C, H // 2, 2, W // 2, 2), axis=(3, 5))

    def conv(v, w_oihw, b):
        y = lax.conv_general_dilated(
            v.astype(jnp.bfloat16), w_oihw.astype(jnp.bfloat16),
            (1, 1), "SAME",
            dimension_numbers=("NCHW", "OIHW", "NCHW"),
            preferred_element_type=jnp.float32)
        return y + b.reshape(1, -1, 1, 1)

    def bn(v, g, be):
        mean = jnp.mean(v, axis=(0, 2, 3), keepdims=True)
        var = jnp.mean((v - mean) ** 2, axis=(0, 2, 3), keepdims=True)
        return (v - mean) * lax.rsqrt(var + EPS) * g.reshape(1, -1, 1, 1) \
            + be.reshape(1, -1, 1, 1)

    y = jax.nn.relu(bn(conv(x, w1, b1), g1, be1))
    y = jax.nn.relu(bn(conv(y, w2, b2), g2, be2))
    y = jax.nn.relu(bn(y, g3, be3))
    return y


if __name__ == "__main__":
    N, Cin, H, W = 2, 4, 16, 16
    Cout = 8

    key = jax.random.PRNGKey(0)
    ks = jax.random.split(key, 12)
    x = jax.random.normal(ks[0], (N, Cin, H, W), jnp.float32)

    # PyTorch-convention parameters: OIHW conv weights, (C,) bias/BN vectors.
    w1 = 0.2 * jax.random.normal(ks[1], (Cout, Cin, 3, 3), jnp.float32)
    b1 = 0.1 * jax.random.normal(ks[2], (Cout,), jnp.float32)
    g1 = 1.0 + 0.1 * jax.random.normal(ks[3], (Cout,), jnp.float32)
    be1 = 0.1 * jax.random.normal(ks[4], (Cout,), jnp.float32)
    w2 = 0.2 * jax.random.normal(ks[5], (Cout, Cout, 3, 3), jnp.float32)
    b2 = 0.1 * jax.random.normal(ks[6], (Cout,), jnp.float32)
    g2 = 1.0 + 0.1 * jax.random.normal(ks[7], (Cout,), jnp.float32)
    be2 = 0.1 * jax.random.normal(ks[8], (Cout,), jnp.float32)
    g3 = 1.0 + 0.1 * jax.random.normal(ks[9], (Cout,), jnp.float32)
    be3 = 0.1 * jax.random.normal(ks[10], (Cout,), jnp.float32)

    params = (w1, b1, g1, be1, w2, b2, g2, be2, g3, be3)

    out = jax.block_until_ready(down_forward(x, *params))
    ref = down_reference(x, *params)

    assert out.shape == (N, Cout, H // 2, W // 2), out.shape
    err = float(jnp.max(jnp.abs(out - ref)))
    # tolerance covers bf16 matmul-input precision (accumulation is f32)
    assert jnp.allclose(out, ref, atol=3e-2, rtol=3e-2), err

    print("KERNEL_OK")
</pallas_src>

<mosaic_0001>
module attributes {stable_mosaic.version = 11 : i64} {
  func.func @_down_kernel(%arg0: memref<8x640xf32, #tpu.memory_space<vmem>>, %arg1: memref<256x128xbf16, #tpu.memory_space<vmem>>, %arg2: memref<1x256xf32, #tpu.memory_space<vmem>>, %arg3: memref<16x72xbf16, #tpu.memory_space<vmem>>, %arg4: memref<8x6xf32, #tpu.memory_space<vmem>>, %arg5: memref<8x256xf32, #tpu.memory_space<vmem>>, %arg6: memref<8x512xbf16, #tpu.memory_space<vmem>>, %arg7: memref<8x512xbf16, #tpu.memory_space<vmem>>, %arg8: memref<72x256xbf16, #tpu.memory_space<vmem>>) attributes {dimension_semantics = [], scalar_prefetch = 0 : i64, scratch_operands = 3 : i64, tpu.core_type = #tpu.core_type<tc>} {
    %c0 = arith.constant 0 : index
    %c0_0 = arith.constant 0 : index
    %0 = vector.load %arg2[%c0, %c0_0] : memref<1x256xf32, #tpu.memory_space<vmem>>, vector<1x256xf32>
    %c0_1 = arith.constant 0 : index
    %c0_2 = arith.constant 0 : index
    %1 = vector.load %arg1[%c0_1, %c0_2] : memref<256x128xbf16, #tpu.memory_space<vmem>>, vector<256x128xbf16>
    %cst = arith.constant 0.000000e+00 : bf16
    %2 = vector.broadcast %cst : bf16 to vector<8x128xbf16>
    %c0_3 = arith.constant 0 : index
    %c0_4 = arith.constant 0 : index
    %3 = vector.load %arg6[%c0_3, %c0_4] : memref<8x512xbf16, #tpu.memory_space<vmem>>, vector<8x128xbf16>
    tpu.vector_store %arg6[%c0_3, %c0_4], %2 {strides = array<i32>} : memref<8x512xbf16, #tpu.memory_space<vmem>>, vector<8x128xbf16>,
    %c0_5 = arith.constant 0 : index
    %c384 = arith.constant 384 : index
    %4 = vector.load %arg6[%c0_5, %c384] : memref<8x512xbf16, #tpu.memory_space<vmem>>, vector<8x128xbf16>
    tpu.vector_store %arg6[%c0_5, %c384], %2 {strides = array<i32>} : memref<8x512xbf16, #tpu.memory_space<vmem>>, vector<8x128xbf16>,
    %c0_6 = arith.constant 0 : index
    %c0_7 = arith.constant 0 : index
    %5 = vector.load %arg0[%c0_6, %c0_7] : memref<8x640xf32, #tpu.memory_space<vmem>>, vector<8x256xf32>
    %c0_8 = arith.constant 0 : index
    %c1 = arith.constant 1 : index
    %6 = vector.load %arg0[%c0_8, %c1] : memref<8x640xf32, #tpu.memory_space<vmem>>, vector<8x256xf32>
    %7 = arith.maximumf %5, %6 : vector<8x256xf32>
    %c0_9 = arith.constant 0 : index
    %c16 = arith.constant 16 : index
    %8 = vector.load %arg0[%c0_9, %c16] : memref<8x640xf32, #tpu.memory_space<vmem>>, vector<8x256xf32>
    %c0_10 = arith.constant 0 : index
    %c17 = arith.constant 17 : index
    %9 = vector.load %arg0[%c0_10, %c17] : memref<8x640xf32, #tpu.memory_space<vmem>>, vector<8x256xf32>
    %10 = arith.maximumf %8, %9 : vector<8x256xf32>
    %11 = arith.maximumf %7, %10 : vector<8x256xf32>
    %12 = arith.truncf %11 : vector<8x256xf32> to vector<8x256xbf16>
    %cst_11 = arith.constant dense<0.000000e+00> : vector<8x128xf32>
    %13 = tpu.matmul %12, %1, %cst_11 {dimension_numbers = #tpu.dot_dimension_numbers<[1], [0], [0], [1], [0, 0, 1, 1], [], []>} : vector<8x256xbf16>, vector<256x128xbf16>, vector<8x128xf32> -> vector<8x128xf32>
    %14 = arith.truncf %13 : vector<8x128xf32> to vector<8x128xbf16>
    %c0_12 = arith.constant 0 : index
    %c128 = arith.constant 128 : index
    %15 = vector.load %arg6[%c0_12, %c128] : memref<8x512xbf16, #tpu.memory_space<vmem>>, vector<8x128xbf16>
    tpu.vector_store %arg6[%c0_12, %c128], %14 {strides = array<i32>} : memref<8x512xbf16, #tpu.memory_space<vmem>>, vector<8x128xbf16>,
    %c0_13 = arith.constant 0 : index
    %c256 = arith.constant 256 : index
    %16 = vector.load %arg0[%c0_13, %c256] : memref<8x640xf32, #tpu.memory_space<vmem>>, vector<8x256xf32>
    %c0_14 = arith.constant 0 : index
    %c257 = arith.constant 257 : index
    %17 = vector.load %arg0[%c0_14, %c257] : memref<8x640xf32, #tpu.memory_space<vmem>>, vector<8x256xf32>
    %18 = arith.maximumf %16, %17 : vector<8x256xf32>
    %c0_15 = arith.constant 0 : index
    %c272 = arith.constant 272 : index
    %19 = vector.load %arg0[%c0_15, %c272] : memref<8x640xf32, #tpu.memory_space<vmem>>, vector<8x256xf32>
    %c0_16 = arith.constant 0 : index
    %c273 = arith.constant 273 : index
    %20 = vector.load %arg0[%c0_16, %c273] : memref<8x640xf32, #tpu.memory_space<vmem>>, vector<8x256xf32>
    %21 = arith.maximumf %19, %20 : vector<8x256xf32>
    %22 = arith.maximumf %18, %21 : vector<8x256xf32>
    %23 = arith.truncf %22 : vector<8x256xf32> to vector<8x256xbf16>
    %cst_17 = arith.constant dense<0.000000e+00> : vector<8x128xf32>
    %24 = tpu.matmul %23, %1, %cst_17 {dimension_numbers = #tpu.dot_dimension_numbers<[1], [0], [0], [1], [0, 0, 1, 1], [], []>} : vector<8x256xbf16>, vector<256x128xbf16>, vector<8x128xf32> -> vector<8x128xf32>
    %25 = arith.truncf %24 : vector<8x128xf32> to vector<8x128xbf16>
    %c0_18 = arith.constant 0 : index
    %c256_19 = arith.constant 256 : index
    %26 = vector.load %arg6[%c0_18, %c256_19] : memref<8x512xbf16, #tpu.memory_space<vmem>>, vector<8x128xbf16>
    tpu.vector_store %arg6[%c0_18, %c256_19], %25 {strides = array<i32>} : memref<8x512xbf16, #tpu.memory_space<vmem>>, vector<8x128xbf16>,
    %c0_20 = arith.constant 0 : index
    %c117 = arith.constant 117 : index
    %27 = vector.load %arg6[%c0_20, %c117] : memref<8x512xbf16, #tpu.memory_space<vmem>>, vector<8x256xbf16>
    %c0_21 = arith.constant 0 : index
    %c0_22 = arith.constant 0 : index
    %28 = vector.load %arg8[%c0_21, %c0_22] : memref<72x256xbf16, #tpu.memory_space<vmem>>, vector<8x256xbf16>
    tpu.vector_store %arg8[%c0_21, %c0_22], %27 {strides = array<i32>} : memref<72x256xbf16, #tpu.memory_space<vmem>>, vector<8x256xbf16>,
    %c0_23 = arith.constant 0 : index
    %c118 = arith.constant 118 : index
    %29 = vector.load %arg6[%c0_23, %c118] : memref<8x512xbf16, #tpu.memory_space<vmem>>, vector<8x256xbf16>
    %c8 = arith.constant 8 : index
    %c0_24 = arith.constant 0 : index
    %30 = vector.load %arg8[%c8, %c0_24] : memref<72x256xbf16, #tpu.memory_space<vmem>>, vector<8x256xbf16>
    tpu.vector_store %arg8[%c8, %c0_24], %29 {strides = array<i32>} : memref<72x256xbf16, #tpu.memory_space<vmem>>, vector<8x256xbf16>,
    %c0_25 = arith.constant 0 : index
    %c119 = arith.constant 119 : index
    %31 = vector.load %arg6[%c0_25, %c119] : memref<8x512xbf16, #tpu.memory_space<vmem>>, vector<8x256xbf16>
    %c16_26 = arith.constant 16 : index
    %c0_27 = arith.constant 0 : index
    %32 = vector.load %arg8[%c16_26, %c0_27] : memref<72x256xbf16, #tpu.memory_space<vmem>>, vector<8x256xbf16>
    tpu.vector_store %arg8[%c16_26, %c0_27], %31 {strides = array<i32>} : memref<72x256xbf16, #tpu.memory_space<vmem>>, vector<8x256xbf16>,
    %c0_28 = arith.constant 0 : index
    %c127 = arith.constant 127 : index
    %33 = vector.load %arg6[%c0_28, %c127] : memref<8x512xbf16, #tpu.memory_space<vmem>>, vector<8x256xbf16>
    %c24 = arith.constant 24 : index
    %c0_29 = arith.constant 0 : index
    %34 = vector.load %arg8[%c24, %c0_29] : memref<72x256xbf16, #tpu.memory_space<vmem>>, vector<8x256xbf16>
    tpu.vector_store %arg8[%c24, %c0_29], %33 {strides = array<i32>} : memref<72x256xbf16, #tpu.memory_space<vmem>>, vector<8x256xbf16>,
    %c0_30 = arith.constant 0 : index
    %c128_31 = arith.constant 128 : index
    %35 = vector.load %arg6[%c0_30, %c128_31] : memref<8x512xbf16, #tpu.memory_space<vmem>>, vector<8x256xbf16>
    %c32 = arith.constant 32 : index
    %c0_32 = arith.constant 0 : index
    %36 = vector.load %arg8[%c32, %c0_32] : memref<72x256xbf16, #tpu.memory_space<vmem>>, vector<8x256xbf16>
    tpu.vector_store %arg8[%c32, %c0_32], %35 {strides = array<i32>} : memref<72x256xbf16, #tpu.memory_space<vmem>>, vector<8x256xbf16>,
    %c0_33 = arith.constant 0 : index
    %c129 = arith.constant 129 : index
    %37 = vector.load %arg6[%c0_33, %c129] : memref<8x512xbf16, #tpu.memory_space<vmem>>, vector<8x256xbf16>
    %c40 = arith.constant 40 : index
    %c0_34 = arith.constant 0 : index
    %38 = vector.load %arg8[%c40, %c0_34] : memref<72x256xbf16, #tpu.memory_space<vmem>>, vector<8x256xbf16>
    tpu.vector_store %arg8[%c40, %c0_34], %37 {strides = array<i32>} : memref<72x256xbf16, #tpu.memory_space<vmem>>, vector<8x256xbf16>,
    %c0_35 = arith.constant 0 : index
    %c137 = arith.constant 137 : index
    %39 = vector.load %arg6[%c0_35, %c137] : memref<8x512xbf16, #tpu.memory_space<vmem>>, vector<8x256xbf16>
    %c48 = arith.constant 48 : index
    %c0_36 = arith.constant 0 : index
    %40 = vector.load %arg8[%c48, %c0_36] : memref<72x256xbf16, #tpu.memory_space<vmem>>, vector<8x256xbf16>
    tpu.vector_store %arg8[%c48, %c0_36], %39 {strides = array<i32>} : memref<72x256xbf16, #tpu.memory_space<vmem>>, vector<8x256xbf16>,
    %c0_37 = arith.constant 0 : index
    %c138 = arith.constant 138 : index
    %41 = vector.load %arg6[%c0_37, %c138] : memref<8x512xbf16, #tpu.memory_space<vmem>>, vector<8x256xbf16>
    %c56 = arith.constant 56 : index
    %c0_38 = arith.constant 0 : index
    %42 = vector.load %arg8[%c56, %c0_38] : memref<72x256xbf16, #tpu.memory_space<vmem>>, vector<8x256xbf16>
    tpu.vector_store %arg8[%c56, %c0_38], %41 {strides = array<i32>} : memref<72x256xbf16, #tpu.memory_space<vmem>>, vector<8x256xbf16>,
    %c0_39 = arith.constant 0 : index
    %c139 = arith.constant 139 : index
    %43 = vector.load %arg6[%c0_39, %c139] : memref<8x512xbf16, #tpu.memory_space<vmem>>, vector<8x256xbf16>
    %c64 = arith.constant 64 : index
    %c0_40 = arith.constant 0 : index
    %44 = vector.load %arg8[%c64, %c0_40] : memref<72x256xbf16, #tpu.memory_space<vmem>>, vector<8x256xbf16>
    tpu.vector_store %arg8[%c64, %c0_40], %43 {strides = array<i32>} : memref<72x256xbf16, #tpu.memory_space<vmem>>, vector<8x256xbf16>,
    %c0_41 = arith.constant 0 : index
    %c0_42 = arith.constant 0 : index
    %45 = vector.load %arg3[%c0_41, %c0_42] : memref<16x72xbf16, #tpu.memory_space<vmem>>, vector<8x72xbf16>
    %c0_43 = arith.constant 0 : index
    %c0_44 = arith.constant 0 : index
    %46 = vector.load %arg8[%c0_43, %c0_44] : memref<72x256xbf16, #tpu.memory_space<vmem>>, vector<72x256xbf16>
    %cst_45 = arith.constant dense<0.000000e+00> : vector<8x256xf32>
    %47 = tpu.matmul %45, %46, %cst_45 {dimension_numbers = #tpu.dot_dimension_numbers<[1], [0], [0], [1], [0, 0, 1, 1], [], []>} : vector<8x72xbf16>, vector<72x256xbf16>, vector<8x256xf32> -> vector<8x256xf32>
    %c0_46 = arith.constant 0 : index
    %c0_47 = arith.constant 0 : index
    %48 = vector.load %arg4[%c0_46, %c0_47] : memref<8x6xf32, #tpu.memory_space<vmem>>, vector<8x1xf32>
    %c0_48 = arith.constant 0 : index
    %c1_49 = arith.constant 1 : index
    %49 = vector.load %arg4[%c0_48, %c1_49] : memref<8x6xf32, #tpu.memory_space<vmem>>, vector<8x1xf32>
    %50 = vector.broadcast %0 : vector<1x256xf32> to vector<8x256xf32>
    %51 = arith.mulf %47, %50 : vector<8x256xf32>
    %cst_50 = arith.constant dense<0.000000e+00> : vector<8xf32>
    %52 = vector.multi_reduction <add>, %51, %cst_50 [1] : vector<8x256xf32> to vector<8xf32>
    %53 = vector.shape_cast %52 : vector<8xf32> to vector<8x1xf32>
    %cst_51 = arith.constant 7.812500e-03 : f32
    %54 = vector.broadcast %cst_51 : f32 to vector<8x1xf32>
    %55 = arith.mulf %53, %54 : vector<8x1xf32>
    %56 = arith.mulf %51, %47 : vector<8x256xf32>
    %cst_52 = arith.constant dense<0.000000e+00> : vector<8xf32>
    %57 = vector.multi_reduction <add>, %56, %cst_52 [1] : vector<8x256xf32> to vector<8xf32>
    %58 = vector.shape_cast %57 : vector<8xf32> to vector<8x1xf32>
    %cst_53 = arith.constant 7.812500e-03 : f32
    %59 = vector.broadcast %cst_53 : f32 to vector<8x1xf32>
    %60 = arith.mulf %58, %59 : vector<8x1xf32>
    %61 = arith.mulf %55, %55 : vector<8x1xf32>
    %62 = arith.subf %60, %61 : vector<8x1xf32>
    %cst_54 = arith.constant 9.99999974E-6 : f32
    %63 = vector.broadcast %cst_54 : f32 to vector<8x1xf32>
    %64 = arith.addf %62, %63 : vector<8x1xf32>
    %65 = math.rsqrt %64 : vector<8x1xf32>
    %66 = arith.mulf %48, %65 : vector<8x1xf32>
    %67 = arith.mulf %55, %66 : vector<8x1xf32>
    %68 = arith.subf %49, %67 : vector<8x1xf32>
    %69 = vector.broadcast %66 : vector<8x1xf32> to vector<8x256xf32>
    %70 = arith.mulf %47, %69 : vector<8x256xf32>
    %71 = vector.broadcast %68 : vector<8x1xf32> to vector<8x256xf32>
    %72 = arith.addf %70, %71 : vector<8x256xf32>
    %cst_55 = arith.constant 0.000000e+00 : f32
    %73 = vector.broadcast %cst_55 : f32 to vector<8x256xf32>
    %74 = arith.maximumf %72, %73 : vector<8x256xf32>
    %75 = vector.broadcast %0 : vector<1x256xf32> to vector<8x256xf32>
    %76 = arith.mulf %74, %75 : vector<8x256xf32>
    %cst_56 = arith.constant 0.000000e+00 : bf16
    %77 = vector.broadcast %cst_56 : bf16 to vector<8x128xbf16>
    %c0_57 = arith.constant 0 : index
    %c0_58 = arith.constant 0 : index
    %78 = vector.load %arg7[%c0_57, %c0_58] : memref<8x512xbf16, #tpu.memory_space<vmem>>, vector<8x128xbf16>
    tpu.vector_store %arg7[%c0_57, %c0_58], %77 {strides = array<i32>} : memref<8x512xbf16, #tpu.memory_space<vmem>>, vector<8x128xbf16>,
    %c0_59 = arith.constant 0 : index
    %c384_60 = arith.constant 384 : index
    %79 = vector.load %arg7[%c0_59, %c384_60] : memref<8x512xbf16, #tpu.memory_space<vmem>>, vector<8x128xbf16>
    tpu.vector_store %arg7[%c0_59, %c384_60], %77 {strides = array<i32>} : memref<8x512xbf16, #tpu.memory_space<vmem>>, vector<8x128xbf16>,
    %80 = arith.truncf %76 : vector<8x256xf32> to vector<8x256xbf16>
    %c0_61 = arith.constant 0 : index
    %c128_62 = arith.constant 128 : index
    %81 = vector.load %arg7[%c0_61, %c128_62] : memref<8x512xbf16, #tpu.memory_space<vmem>>, vector<8x256xbf16>
    tpu.vector_store %arg7[%c0_61, %c128_62], %80 {strides = array<i32>} : memref<8x512xbf16, #tpu.memory_space<vmem>>, vector<8x256xbf16>,
    %c0_63 = arith.constant 0 : index
    %c117_64 = arith.constant 117 : index
    %82 = vector.load %arg7[%c0_63, %c117_64] : memref<8x512xbf16, #tpu.memory_space<vmem>>, vector<8x256xbf16>
    %c0_65 = arith.constant 0 : index
    %c0_66 = arith.constant 0 : index
    %83 = vector.load %arg8[%c0_65, %c0_66] : memref<72x256xbf16, #tpu.memory_space<vmem>>, vector<8x256xbf16>
    tpu.vector_store %arg8[%c0_65, %c0_66], %82 {strides = array<i32>} : memref<72x256xbf16, #tpu.memory_space<vmem>>, vector<8x256xbf16>,
    %c0_67 = arith.constant 0 : index
    %c118_68 = arith.constant 118 : index
    %84 = vector.load %arg7[%c0_67, %c118_68] : memref<8x512xbf16, #tpu.memory_space<vmem>>, vector<8x256xbf16>
    %c8_69 = arith.constant 8 : index
    %c0_70 = arith.constant 0 : index
    %85 = vector.load %arg8[%c8_69, %c0_70] : memref<72x256xbf16, #tpu.memory_space<vmem>>, vector<8x256xbf16>
    tpu.vector_store %arg8[%c8_69, %c0_70], %84 {strides = array<i32>} : memref<72x256xbf16, #tpu.memory_space<vmem>>, vector<8x256xbf16>,
    %c0_71 = arith.constant 0 : index
    %c119_72 = arith.constant 119 : index
    %86 = vector.load %arg7[%c0_71, %c119_72] : memref<8x512xbf16, #tpu.memory_space<vmem>>, vector<8x256xbf16>
    %c16_73 = arith.constant 16 : index
    %c0_74 = arith.constant 0 : index
    %87 = vector.load %arg8[%c16_73, %c0_74] : memref<72x256xbf16, #tpu.memory_space<vmem>>, vector<8x256xbf16>
    tpu.vector_store %arg8[%c16_73, %c0_74], %86 {strides = array<i32>} : memref<72x256xbf16, #tpu.memory_space<vmem>>, vector<8x256xbf16>,
    %c0_75 = arith.constant 0 : index
    %c127_76 = arith.constant 127 : index
    %88 = vector.load %arg7[%c0_75, %c127_76] : memref<8x512xbf16, #tpu.memory_space<vmem>>, vector<8x256xbf16>
    %c24_77 = arith.constant 24 : index
    %c0_78 = arith.constant 0 : index
    %89 = vector.load %arg8[%c24_77, %c0_78] : memref<72x256xbf16, #tpu.memory_space<vmem>>, vector<8x256xbf16>
    tpu.vector_store %arg8[%c24_77, %c0_78], %88 {strides = array<i32>} : memref<72x256xbf16, #tpu.memory_space<vmem>>, vector<8x256xbf16>,
    %c0_79 = arith.constant 0 : index
    %c128_80 = arith.constant 128 : index
    %90 = vector.load %arg7[%c0_79, %c128_80] : memref<8x512xbf16, #tpu.memory_space<vmem>>, vector<8x256xbf16>
    %c32_81 = arith.constant 32 : index
    %c0_82 = arith.constant 0 : index
    %91 = vector.load %arg8[%c32_81, %c0_82] : memref<72x256xbf16, #tpu.memory_space<vmem>>, vector<8x256xbf16>
    tpu.vector_store %arg8[%c32_81, %c0_82], %90 {strides = array<i32>} : memref<72x256xbf16, #tpu.memory_space<vmem>>, vector<8x256xbf16>,
    %c0_83 = arith.constant 0 : index
    %c129_84 = arith.constant 129 : index
    %92 = vector.load %arg7[%c0_83, %c129_84] : memref<8x512xbf16, #tpu.memory_space<vmem>>, vector<8x256xbf16>
    %c40_85 = arith.constant 40 : index
    %c0_86 = arith.constant 0 : index
    %93 = vector.load %arg8[%c40_85, %c0_86] : memref<72x256xbf16, #tpu.memory_space<vmem>>, vector<8x256xbf16>
    tpu.vector_store %arg8[%c40_85, %c0_86], %92 {strides = array<i32>} : memref<72x256xbf16, #tpu.memory_space<vmem>>, vector<8x256xbf16>,
    %c0_87 = arith.constant 0 : index
    %c137_88 = arith.constant 137 : index
    %94 = vector.load %arg7[%c0_87, %c137_88] : memref<8x512xbf16, #tpu.memory_space<vmem>>, vector<8x256xbf16>
    %c48_89 = arith.constant 48 : index
    %c0_90 = arith.constant 0 : index
    %95 = vector.load %arg8[%c48_89, %c0_90] : memref<72x256xbf16, #tpu.memory_space<vmem>>, vector<8x256xbf16>
    tpu.vector_store %arg8[%c48_89, %c0_90], %94 {strides = array<i32>} : memref<72x256xbf16, #tpu.memory_space<vmem>>, vector<8x256xbf16>,
    %c0_91 = arith.constant 0 : index
    %c138_92 = arith.constant 138 : index
    %96 = vector.load %arg7[%c0_91, %c138_92] : memref<8x512xbf16, #tpu.memory_space<vmem>>, vector<8x256xbf16>
    %c56_93 = arith.constant 56 : index
    %c0_94 = arith.constant 0 : index
    %97 = vector.load %arg8[%c56_93, %c0_94] : memref<72x256xbf16, #tpu.memory_space<vmem>>, vector<8x256xbf16>
    tpu.vector_store %arg8[%c56_93, %c0_94], %96 {strides = array<i32>} : memref<72x256xbf16, #tpu.memory_space<vmem>>, vector<8x256xbf16>,
    %c0_95 = arith.constant 0 : index
    %c139_96 = arith.constant 139 : index
    %98 = vector.load %arg7[%c0_95, %c139_96] : memref<8x512xbf16, #tpu.memory_space<vmem>>, vector<8x256xbf16>
    %c64_97 = arith.constant 64 : index
    %c0_98 = arith.constant 0 : index
    %99 = vector.load %arg8[%c64_97, %c0_98] : memref<72x256xbf16, #tpu.memory_space<vmem>>, vector<8x256xbf16>
    tpu.vector_store %arg8[%c64_97, %c0_98], %98 {strides = array<i32>} : memref<72x256xbf16, #tpu.memory_space<vmem>>, vector<8x256xbf16>,
    %c8_99 = arith.constant 8 : index
    %c0_100 = arith.constant 0 : index
    %100 = vector.load %arg3[%c8_99, %c0_100] : memref<16x72xbf16, #tpu.memory_space<vmem>>, vector<8x72xbf16>
    %c0_101 = arith.constant 0 : index
    %c0_102 = arith.constant 0 : index
    %101 = vector.load %arg8[%c0_101, %c0_102] : memref<72x256xbf16, #tpu.memory_space<vmem>>, vector<72x256xbf16>
    %cst_103 = arith.constant dense<0.000000e+00> : vector<8x256xf32>
    %102 = tpu.matmul %100, %101, %cst_103 {dimension_numbers = #tpu.dot_dimension_numbers<[1], [0], [0], [1], [0, 0, 1, 1], [], []>} : vector<8x72xbf16>, vector<72x256xbf16>, vector<8x256xf32> -> vector<8x256xf32>
    %c0_104 = arith.constant 0 : index
    %c2 = arith.constant 2 : index
    %103 = vector.load %arg4[%c0_104, %c2] : memref<8x6xf32, #tpu.memory_space<vmem>>, vector<8x1xf32>
    %c0_105 = arith.constant 0 : index
    %c3 = arith.constant 3 : index
    %104 = vector.load %arg4[%c0_105, %c3] : memref<8x6xf32, #tpu.memory_space<vmem>>, vector<8x1xf32>
    %105 = vector.broadcast %0 : vector<1x256xf32> to vector<8x256xf32>
    %106 = arith.mulf %102, %105 : vector<8x256xf32>
    %cst_106 = arith.constant dense<0.000000e+00> : vector<8xf32>
    %107 = vector.multi_reduction <add>, %106, %cst_106 [1] : vector<8x256xf32> to vector<8xf32>
    %108 = vector.shape_cast %107 : vector<8xf32> to vector<8x1xf32>
    %cst_107 = arith.constant 7.812500e-03 : f32
    %109 = vector.broadcast %cst_107 : f32 to vector<8x1xf32>
    %110 = arith.mulf %108, %109 : vector<8x1xf32>
    %111 = arith.mulf %106, %102 : vector<8x256xf32>
    %cst_108 = arith.constant dense<0.000000e+00> : vector<8xf32>
    %112 = vector.multi_reduction <add>, %111, %cst_108 [1] : vector<8x256xf32> to vector<8xf32>
    %113 = vector.shape_cast %112 : vector<8xf32> to vector<8x1xf32>
    %cst_109 = arith.constant 7.812500e-03 : f32
    %114 = vector.broadcast %cst_109 : f32 to vector<8x1xf32>
    %115 = arith.mulf %113, %114 : vector<8x1xf32>
    %116 = arith.mulf %110, %110 : vector<8x1xf32>
    %117 = arith.subf %115, %116 : vector<8x1xf32>
    %cst_110 = arith.constant 9.99999974E-6 : f32
    %118 = vector.broadcast %cst_110 : f32 to vector<8x1xf32>
    %119 = arith.addf %117, %118 : vector<8x1xf32>
    %120 = math.rsqrt %119 : vector<8x1xf32>
    %121 = arith.mulf %103, %120 : vector<8x1xf32>
    %122 = arith.mulf %110, %121 : vector<8x1xf32>
    %123 = arith.subf %104, %122 : vector<8x1xf32>
    %124 = vector.broadcast %121 : vector<8x1xf32> to vector<8x256xf32>
    %125 = arith.mulf %102, %124 : vector<8x256xf32>
    %126 = vector.broadcast %123 : vector<8x1xf32> to vector<8x256xf32>
    %127 = arith.addf %125, %126 : vector<8x256xf32>
    %cst_111 = arith.constant 0.000000e+00 : f32
    %128 = vector.broadcast %cst_111 : f32 to vector<8x256xf32>
    %129 = arith.maximumf %127, %128 : vector<8x256xf32>
    %c0_112 = arith.constant 0 : index
    %c4 = arith.constant 4 : index
    %130 = vector.load %arg4[%c0_112, %c4] : memref<8x6xf32, #tpu.memory_space<vmem>>, vector<8x1xf32>
    %c0_113 = arith.constant 0 : index
    %c5 = arith.constant 5 : index
    %131 = vector.load %arg4[%c0_113, %c5] : memref<8x6xf32, #tpu.memory_space<vmem>>, vector<8x1xf32>
    %132 = vector.broadcast %0 : vector<1x256xf32> to vector<8x256xf32>
    %133 = arith.mulf %129, %132 : vector<8x256xf32>
    %cst_114 = arith.constant dense<0.000000e+00> : vector<8xf32>
    %134 = vector.multi_reduction <add>, %133, %cst_114 [1] : vector<8x256xf32> to vector<8xf32>
    %135 = vector.shape_cast %134 : vector<8xf32> to vector<8x1xf32>
    %cst_115 = arith.constant 7.812500e-03 : f32
    %136 = vector.broadcast %cst_115 : f32 to vector<8x1xf32>
    %137 = arith.mulf %135, %136 : vector<8x1xf32>
    %138 = arith.mulf %133, %129 : vector<8x256xf32>
    %cst_116 = arith.constant dense<0.000000e+00> : vector<8xf32>
    %139 = vector.multi_reduction <add>, %138, %cst_116 [1] : vector<8x256xf32> to vector<8xf32>
    %140 = vector.shape_cast %139 : vector<8xf32> to vector<8x1xf32>
    %cst_117 = arith.constant 7.812500e-03 : f32
    %141 = vector.broadcast %cst_117 : f32 to vector<8x1xf32>
    %142 = arith.mulf %140, %141 : vector<8x1xf32>
    %143 = arith.mulf %137, %137 : vector<8x1xf32>
    %144 = arith.subf %142, %143 : vector<8x1xf32>
    %cst_118 = arith.constant 9.99999974E-6 : f32
    %145 = vector.broadcast %cst_118 : f32 to vector<8x1xf32>
    %146 = arith.addf %144, %145 : vector<8x1xf32>
    %147 = math.rsqrt %146 : vector<8x1xf32>
    %148 = arith.mulf %130, %147 : vector<8x1xf32>
    %149 = arith.mulf %137, %148 : vector<8x1xf32>
    %150 = arith.subf %131, %149 : vector<8x1xf32>
    %151 = vector.broadcast %148 : vector<8x1xf32> to vector<8x256xf32>
    %152 = arith.mulf %129, %151 : vector<8x256xf32>
    %153 = vector.broadcast %150 : vector<8x1xf32> to vector<8x256xf32>
    %154 = arith.addf %152, %153 : vector<8x256xf32>
    %cst_119 = arith.constant 0.000000e+00 : f32
    %155 = vector.broadcast %cst_119 : f32 to vector<8x256xf32>
    %156 = arith.maximumf %154, %155 : vector<8x256xf32>
    %c0_120 = arith.constant 0 : index
    %c0_121 = arith.constant 0 : index
    %157 = vector.load %arg5[%c0_120, %c0_121] : memref<8x256xf32, #tpu.memory_space<vmem>>, vector<8x256xf32>
    tpu.vector_store %arg5[%c0_120, %c0_121], %156 {strides = array<i32>} : memref<8x256xf32, #tpu.memory_space<vmem>>, vector<8x256xf32>,
    return
  }
}

</mosaic_0001>

<bundles_post_ra>
// kernel: down_forward.1
= control target key start
LH: loop header
LB: loop body
LE: loop exit
PB: predicated region body
PF: predicated region fallthrough
CT: control target
= control target key end

     0   :  { %s1074_s30 = smov 127   ;;  %vm68_vm0 = vcmask 1039360   ;;  %v1076_v44 = vmov 0   ;;  %s1077_s10 = smov 117   ;;  %vm86_vm1 = vcmask 916480   ;;  %vm326_vm2 = vcmask 1043456   ;;  %s1330_s0 = inlined_call_operand.vmem [shape: f32[8,640], index: 0, kind: input, shape index: {}]   ;;  %s1331_s1 = inlined_call_operand.vmem [shape: bf16[256,128], index: 1, kind: input, shape index: {}]   ;;  %s1332_s3 = inlined_call_operand.vmem [shape: bf16[16,72], index: 3, kind: input, shape index: {}]   ;;  %s1333_s2 = inlined_call_operand.vmem [shape: f32[1,256], index: 2, kind: input, shape index: {}]   ;;  %s1334_s4 = inlined_call_operand.vmem [shape: f32[8,6], index: 4, kind: input, shape index: {}]   ;;  %s1335_s5 = inlined_call_operand.vmem [shape: f32[8,256], index: 5, kind: output, shape index: {}]  }
   0x1   :  { %v1122_v0 = vld [vmem:[%s1330_s0 + $0x8] sm:$0xff]  ;;  %v1127_v1 = vld [vmem:[%s1330_s0 + $0x10] sm:$0xff]  ;;  %v1132_v2 = vld [vmem:[%s1330_s0] sm:$0xff]  ;;  %55 = vst [vmem:[#allocation2 + $0xc] sm:$0xf] %v1076_v44  ;;  %1045 = vset.pattern.permute.xlu1 %v1076_v44  ;;  %s1078_s11 = smov 119  }
   0x2   :  { %v1015_v3 = vpack.i.bf16 %v1127_v1, %v1122_v0  ;;  %v1025_v4 = vpack.i.bf16 %v1127_v1, %v1132_v2  ;;  %v1141_v5 = vld [vmem:[%s1330_s0 + $0x18] sm:$0xff]  ;;  %v1146_v6 = vld [vmem:[%s1330_s0 + $0x20] sm:$0xff]  ;;  %v1054_v10 = vld [vmem:[%s1331_s1 + $0x70] sm:$0xff]   ;;  %54 = vst [vmem:[#allocation2] sm:$0xf] %v1076_v44  ;;  %s1079_s12 = smov 118  }
   0x3   :  { %v1052_v7 = vld [vmem:[%s1331_s1 + $0x78] sm:$0xff]   ;;  %v1020_v8 = vpack.i.bf16 %v1146_v6, %v1141_v5  ;;  %v1055_v11 = vld [vmem:[%s1331_s1 + $0x30] sm:$0xff]   ;;  %v1056_v12 = vld [vmem:[%s1331_s1 + $0x68] sm:$0xff]   ;;  %599 = vst [vmem:[#allocation3] sm:$0xf] %v1076_v44  ;;  %s1080_s13 = smov 9  }
   0x4   :  { %1016 = vrot.lane.b32.xlu0 %v1015_v3, %s1074_s30  ;;  %1026 = vrot.lane.b32.xlu1 %v1025_v4, %s1074_s30  ;;  %v1053_v9 = vld [vmem:[%s1331_s1 + $0x38] sm:$0xff]   ;;  %v1057_v13 = vld [vmem:[%s1331_s1 + $0x28] sm:$0xff]   ;;  %600 = vst [vmem:[#allocation3 + $0xc] sm:$0xf] %v1076_v44  ;;  %s1081_s14 = smov 1   ;;  %s1082_s15 = smov 11  }
   0x5   :  { %956 = vmatprep.subr.bf16.mxu0 %v1052_v7  ;;  %978 = vmatprep.subr.bf16.mxu1 %v1052_v7  ;;  %v1058_v14 = vld [vmem:[%s1331_s1 + $0x60] sm:$0xff]   ;;  %v1060_v16 = vld [vmem:[%s1331_s1 + $0x58] sm:$0xff]   ;;  %v1062_v18 = vld [vmem:[%s1331_s1 + $0x50] sm:$0xff]   ;;  %s1083_s16 = smov 10   ;;  %vm435_vm3 = vcmask 957440   ;;  %vm405_vm4 = vcmask 973824  }
   0x6   :  { %957 = vmatpush3.bf16.msra.mxu0 %v1053_v9  ;;  %979 = vmatpush3.bf16.msra.mxu1 %v1053_v9  ;;  %v1059_v15 = vld [vmem:[%s1331_s1 + $0x20] sm:$0xff]   ;;  %v1061_v17 = vld [vmem:[%s1331_s1 + $0x18] sm:$0xff]   ;;  %v1063_v19 = vld [vmem:[%s1331_s1 + $0x10] sm:$0xff]   ;;  %vm420_vm5 = vcmask 965632   ;;  %vm358_vm6 = vcmask 72704   ;;  %vm373_vm7 = vcmask 7168  }
   0x7   :  { %958 = vmatprep.subr.bf16.mxu0 %v1054_v10  ;;  %980 = vmatprep.subr.bf16.mxu1 %v1054_v10  ;;  %v1064_v20 = vld [vmem:[%s1331_s1 + $0x48] sm:$0xff]   ;;  %v1066_v22 = vld [vmem:[%s1331_s1 + $0x40] sm:$0xff]   ;;  %vm328_vm8 = vcmask 89088   ;;  %vm343_vm9 = vcmask 80896   ;;  %vm494_vm10 = vcmask 588800  }
   0x8   :  { %1021 = vrot.lane.b32.xlu0 %v1020_v8, %s1074_s30  ;;  %v1065_v21 = vld [vmem:[%s1331_s1 + $0x8] sm:$0xff]   ;;  %v1067_v28 = vld [vmem:[%s1331_s1] sm:$0xff]   ;;  %s1075_s1 = smov 112  }
   0x9   :  { %v425_v47 = vld [vmem:[#allocation2 + $0xc] sm:$0xf] }
   0xa   :  { %959 = vmatpush3.bf16.msra.mxu0 %v1055_v11  ;;  %981 = vmatpush3.bf16.msra.mxu1 %v1055_v11  ;;  %v380_v7 = vld [vmem:[#allocation2 + $0xc] sm:$0xf] }
   0xb   :  { %960 = vmatprep.subr.bf16.mxu0 %v1056_v12  ;;  %982 = vmatprep.subr.bf16.mxu1 %v1056_v12 }
   0xe   :  { %961 = vmatpush3.bf16.msra.mxu0 %v1057_v13  ;;  %983 = vmatpush3.bf16.msra.mxu1 %v1057_v13 }
   0xf   :  { %962 = vmatprep.subr.bf16.mxu0 %v1058_v14  ;;  %984 = vmatprep.subr.bf16.mxu1 %v1058_v14 }
  0x12   :  { %963 = vmatpush3.bf16.msra.mxu0 %v1059_v15  ;;  %985 = vmatpush3.bf16.msra.mxu1 %v1059_v15 }
  0x13   :  { %964 = vmatprep.subr.bf16.mxu0 %v1060_v16  ;;  %986 = vmatprep.subr.bf16.mxu1 %v1060_v16 }
  0x16   :  { %965 = vmatpush3.bf16.msra.mxu0 %v1061_v17  ;;  %987 = vmatpush3.bf16.msra.mxu1 %v1061_v17 }
  0x17   :  { %966 = vmatprep.subr.bf16.mxu0 %v1062_v18  ;;  %988 = vmatprep.subr.bf16.mxu1 %v1062_v18 }
  0x1a   :  { %967 = vmatpush3.bf16.msra.mxu0 %v1063_v19  ;;  %989 = vmatpush3.bf16.msra.mxu1 %v1063_v19 }
  0x1b   :  { %968 = vmatprep.subr.bf16.mxu0 %v1064_v20  ;;  %990 = vmatprep.subr.bf16.mxu1 %v1064_v20 }
  0x1e   :  { %969 = vmatpush3.bf16.msra.mxu0 %v1065_v21  ;;  %991 = vmatpush3.bf16.msra.mxu1 %v1065_v21 }
  0x1f   :  { %970 = vmatprep.subr.bf16.mxu0 %v1066_v22  ;;  %992 = vmatprep.subr.bf16.mxu1 %v1066_v22 }
  0x22   :  { %971 = vmatpush3.bf16.msra.mxu0 %v1067_v28  ;;  %993 = vmatpush3.bf16.msra.mxu1 %v1067_v28 }
  0x76   :  { %v1017_v23 = vpop.permute.xlu0 %1016  ;;  %v1027_v24 = vpop.permute.xlu1 %1026 }
  0x77   :  { %v1019_v25 = vunpack.i.h.bf16 %v1017_v23  ;;  %v1018_v26 = vunpack.i.l.bf16 %v1017_v23  ;;  %v1028_v27 = vunpack.i.l.bf16 %v1027_v24  ;;  %v1029_v31 = vunpack.i.h.bf16 %v1027_v24 }
  0x79   :  { %v76_v29 = vmax.f32 %v1127_v1, %v1019_v25  ;;  %v70_v30 = vsel %vm68_vm0, %v1018_v26, %v1019_v25  ;;  %v69_v34 = vsel %vm68_vm0, %v1028_v27, %v1018_v26 }
  0x7a   :  { %v1022_v32 = vpop.permute.xlu0 %1021  ;;  %v74_v33 = vmax.f32 %v1122_v0, %v70_v30  ;;  %v73_v42 = vmax.f32 %v1132_v2, %v69_v34 }
  0x7b   :  { %v1024_v35 = vunpack.i.h.bf16 %v1022_v32  ;;  %v1023_v36 = vunpack.i.l.bf16 %v1022_v32 }
  0x7c   :  { %v1030_v37 = vpack.i.bf16 %v76_v29, %v74_v33 }
  0x7d   :  { %v256_v38 = vmax.f32 %v1146_v6, %v1024_v35  ;;  %v247_v39 = vsel %vm68_vm0, %v1029_v31, %v1023_v36  ;;  %v248_v40 = vsel %vm68_vm0, %v1023_v36, %v1024_v35  ;;  %v410_v6 = vld [vmem:[#allocation2 + $0xc] sm:$0xf] }
  0x7e   :  { %1031 = vrot.lane.b32.xlu1 %v1030_v37, %s1075_s1  ;;  %v255_v41 = vmax.f32 %v1141_v5, %v248_v40  ;;  %v254_v43 = vmax.f32 %v1127_v1, %v247_v39  ;;  %v395_v5 = vld [vmem:[#allocation2 + $0xc] sm:$0xf] }
  0x80   :  { %v1035_v45 = vpack.i.bf16 %v256_v38, %v255_v41  ;;  %v1040_v46 = vpack.i.bf16 %v254_v43, %v73_v42 }
  0x82   :  { %1036 = vrot.lane.b32.xlu0 %v1035_v45, %s1075_s1  ;;  %1041 = vrot.lane.b32.xlu1 %v1040_v46, %s1075_s1 }
  0x86   :  { %430 = vrot.lane.b32.xlu1 %v425_v47, %s1077_s10 }
  0x8a   :  { %400 = vrot.lane.b32.xlu1 %v395_v5, %s1078_s11 }
  0x8e   :  { %415 = vrot.lane.b32.xlu1 %v410_v6, %s1079_s12 }
  0x92   :  { %385 = vrot.lane.b32.xlu1 %v380_v7, %s1074_s30 }
  0xf0   :  { %v1032_v48 = vpop.permute.xlu1 %1031 }
  0xf1   :  { %v1034_v49 = vunpack.i.h.bf16 %v1032_v48  ;;  %v1033_v50 = vunpack.i.l.bf16 %v1032_v48 }
  0xf3   :  { %v88_v51 = vsel %vm86_vm1, %v1033_v50, %v1034_v49 }
  0xf4   :  { %v1037_v52 = vpop.permute.xlu0 %1036  ;;  %v1042_v53 = vpop.permute.xlu1 %1041  ;;  %v92_v54 = vmax.f32 %v74_v33, %v88_v51 }
  0xf5   :  { %v1039_v55 = vunpack.i.h.bf16 %v1037_v52  ;;  %v1038_v56 = vunpack.i.l.bf16 %v1037_v52  ;;  %v1044_v57 = vunpack.i.h.bf16 %v1042_v53  ;;  %v1043_v58 = vunpack.i.l.bf16 %v1042_v53 }
  0xf6   :  { %v94_v59 = vpack.c.bf16 %v92_v54, %v92_v54 }
  0xf7   :  { %v87_v60 = vsel %vm86_vm1, %v1043_v58, %v1033_v50  ;;  %v267_v61 = vsel %vm86_vm1, %v1038_v56, %v1039_v55  ;;  %v266_v62 = vsel %vm86_vm1, %v1044_v57, %v1038_v56 }
  0xf8   :  { %223 = vmatprep.mubr.bf16.mxu0 %v94_v59  ;;  %v91_v63 = vmax.f32 %v73_v42, %v87_v60  ;;  %v271_v0 = vmax.f32 %v255_v41, %v267_v61  ;;  %v270_v1 = vmax.f32 %v254_v43, %v266_v62  ;;  %v431_v26 = vpop.permute.xlu1 %430 }
  0xf9   :  { %v433_v29 = vrot.slane %v431_v26, 4 }
  0xfa   :  { %v93_v2 = vpack.c.bf16 %v91_v63, %v91_v63  ;;  %v273_v3 = vpack.c.bf16 %v271_v0, %v271_v0  ;;  %v272_v4 = vpack.c.bf16 %v270_v1, %v270_v1 }
  0xfc   :  { %224 = vmatmul.mubr.bf16.vlgmr.msra.gmra.mxu0 %v93_v2  ;;  %306 = vmatprep.mubr.bf16.mxu1 %v273_v3  ;;  %v401_v27 = vpop.permute.xlu1 %400 }
  0xfd   :  { %307 = vmatmul.mubr.bf16.vlgmr.msra.gmra.mxu1 %v272_v4  ;;  %537 = vmatprep.mubr.bf16.mxu0 %v1076_v44  ;;  %v403_v36 = vrot.slane %v401_v27, 4 }
  0xfe   :  { %820 = vmatprep.mubr.bf16.mxu1 %v1076_v44 }
 0x100   :  { %v416_v28 = vpop.permute.xlu1 %415 }
 0x101   :  { %v418_v40 = vrot.slane %v416_v28, 4 }
 0x104   :  { %v386_v32 = vpop.permute.xlu1 %385 }
 0x105   :  { %v388_v46 = vrot.slane %v386_v32, 4 }
 0x1bc   :  { %v972_v8 = vpop.f32.mrf.mxu0 }
 0x1bd   :  { %v994_v9 = vpop.f32.mrf.mxu1 }
 0x1be   :  { %v973_v10 = vpop.f32.mrf.mxu0 }
 0x1bf   :  { %v974_v11 = vadd.f32 %v973_v10, %v972_v8  ;;  %v995_v12 = vpop.f32.mrf.mxu1 }
 0x1c0   :  { %v996_v13 = vadd.f32 %v995_v12, %v994_v9  ;;  %v975_v14 = vpop.f32.mrf.mxu0 }
 0x1c1   :  { %v231_v15 = vpack.c.bf16 %v974_v11, %v974_v11  ;;  %v997_v16 = vpop.f32.mrf.mxu1 }
 0x1c2   :  { %v314_v17 = vpack.c.bf16 %v996_v13, %v996_v13  ;;  %v976_v18 = vpop.f32.mrf.mxu0 }
 0x1c3   :  { %232 = vst [vmem:[#allocation2 + $0x4] sm:$0xf] %v231_v15  ;;  %v998_v19 = vpop.f32.mrf.mxu1 }
 0x1c4   :  { %315 = vst [vmem:[#allocation2 + $0x8] sm:$0xf] %v314_v17 }
 0x1ca   :  { %v347_v25 = vld [vmem:[#allocation2] sm:$0xff] }
 0x1cb   :  { %v348_v20 = vld [vmem:[#allocation2 + $0x8] sm:$0xf] }
 0x1cc   :  { %v1215_v21 = vld [vmem:[#allocation2 + $0x4] sm:$0xff]  ;;  %353 = vrot.lane.b32.xlu1 %v348_v20, %s1080_s13 }
 0x1cd   :  { %428 = vrot.lane.b32.xlu0 %v1215_v21, %s1077_s10  ;;  %v363_v22 = vld [vmem:[#allocation2 + $0x8] sm:$0xf] }
 0x1ce   :  { %v317_v23 = vld [vmem:[#allocation2 + $0x8] sm:$0xf] }
 0x1cf   :  { %v333_v24 = vld [vmem:[#allocation2 + $0x8] sm:$0xf] }
 0x1d0   :  { %368 = vrot.lane.b32.xlu1 %v363_v22, %s1081_s14  ;;  %v548_v22 = vlaneseq }
 0x1d1   :  { %398 = vrot.lane.b32.xlu0 %v1215_v21, %s1078_s11 }
 0x1d4   :  { %322 = vrot.lane.b32.xlu1 %v317_v23, %s1082_s15  ;;  %v549_v23 = vshrl.u32 %v548_v22, 7 }
 0x1d5   :  { %413 = vrot.lane.b32.xlu0 %v1215_v21, %s1079_s12 }
 0x1d6   :  { %v554_v26 = vsub.s32 1, %v549_v23 }
 0x1d8   :  { %338 = vrot.lane.b32.xlu1 %v333_v24, %s1083_s16  ;;  %v550_v24 = vsub.s32 0, %v549_v23 }
 0x1d9   :  { %383 = vrot.lane.b32.xlu0 %v1215_v21, %s1074_s30 }
 0x1dd   :  { %351 = vrot.lane.b32.xlu0 %v347_v25, %s1080_s13 }
 0x1e1   :  { %366 = vrot.lane.b32.xlu0 %v347_v25, %s1081_s14 }
 0x1e5   :  { %320 = vrot.lane.b32.xlu0 %v347_v25, %s1082_s15 }
 0x1e9   :  { %336 = vrot.lane.b32.xlu0 %v347_v25, %s1083_s16  ;;  %v21_v25 = vld [vmem:[%s1333_s2] sm:$0x3] }
 0x1ea   :  { %v1260_v27 = vrot.slane %v21_v25, %v550_v24  ;;  %v1262_v28 = vrot.slane %v21_v25, %v554_v26 }
 0x23e   :  { %v354_v42 = vpop.permute.xlu1 %353 }
 0x23f   :  { %v429_v30 = vpop.permute.xlu0 %428  ;;  %v356_v61 = vrot.slane %v354_v42, 4 }
 0x240   :  { %v432_v31 = vrot.slane %v429_v30, 4 }
 0x242   :  { %v434_v33 = vsel %vm326_vm2, %v432_v31, %v433_v29  ;;  %v369_v54 = vpop.permute.xlu1 %368 }
 0x243   :  { %v436_v34 = vsel %vm435_vm3, %v429_v30, %v434_v33  ;;  %v399_v35 = vpop.permute.xlu0 %398  ;;  %v371_v0 = vrot.slane %v369_v54, 4 }
 0x244   :  { %v938_v37 = vcombine.low %v436_v34, %v436_v34  ;;  %v939_v38 = vcombine.high %v436_v34, %v436_v34  ;;  %v402_v39 = vrot.slane %v399_v35, 4 }
 0x246   :  { %940 = vmatprep.subr.msk.bf16.mxu0 %vm326_vm2, %v939_v38  ;;  %v500_v41 = vsel %vm326_vm2, %v938_v37, 0  ;;  %v404_v44 = vsel %vm326_vm2, %v402_v39, %v403_v36  ;;  %v323_v62 = vpop.permute.xlu1 %322 }
 0x247   :  { %512 = vmatpush1.bf16.msra.mxu0 %v500_v41  ;;  %v414_v43 = vpop.permute.xlu0 %413  ;;  %v406_v48 = vsel %vm405_vm4, %v399_v35, %v404_v44  ;;  %v325_v11 = vrot.slane %v323_v62, 4 }
 0x248   :  { %v417_v45 = vrot.slane %v414_v43, 4 }
 0x24a   :  { %v419_v47 = vsel %vm326_vm2, %v417_v45, %v418_v40  ;;  %v339_v10 = vpop.permute.xlu1 %338 }
 0x24b   :  { %v421_v49 = vsel %vm420_vm5, %v414_v43, %v419_v47  ;;  %v384_v50 = vpop.permute.xlu0 %383  ;;  %v341_v13 = vrot.slane %v339_v10, 4  ;;  %v1269_v47 = vld [vmem:[%s1334_s4] sm:$0xff] }
 0x24c   :  { %v936_v51 = vcombine.low %v406_v48, %v421_v49  ;;  %v937_v52 = vcombine.high %v406_v48, %v421_v49  ;;  %v387_v53 = vrot.slane %v384_v50, 4 }
 0x24e   :  { %v389_v55 = vsel %vm326_vm2, %v387_v53, %v388_v46  ;;  %513 = vmatprep.subr.bf16.mxu0 %v937_v52  ;;  %v1084_v46 = vmov 1   ;;  %v683_v52 = vld [vmem:[#allocation3 + $0xc] sm:$0xf] }
 0x24f   :  { %v391_v56 = vsel %vm68_vm0, %v384_v50, %v389_v55  ;;  %514 = vmatpush1.bf16.msra.mxu0 %v936_v51  ;;  %v352_v57 = vpop.permute.xlu0 %351  ;;  %1046 = vset.pattern.permute.xlu0 %v1084_v46  ;;  %v711_v51 = vld [vmem:[#allocation3 + $0xc] sm:$0xf] }
 0x250   :  { %v934_v58 = vcombine.low %v1215_v21, %v391_v56  ;;  %v935_v59 = vcombine.high %v1215_v21, %v391_v56  ;;  %v355_v60 = vrot.slane %v352_v57, 4  ;;  %v439_v21 = vld [vmem:[%s1332_s3] sm:$0xf]  ;;  %v697_v53 = vld [vmem:[#allocation3 + $0xc] sm:$0xf] }
 0x251   :  { %v669_v56 = vld [vmem:[#allocation3 + $0xc] sm:$0xf] }
 0x252   :  { %515 = vmatprep.subr.bf16.mxu0 %v935_v59  ;;  %v357_v1 = vsel %vm326_vm2, %v355_v60, %v356_v61 }
 0x253   :  { %516 = vmatpush1.bf16.msra.mxu0 %v934_v58  ;;  %v367_v63 = vpop.permute.xlu0 %366  ;;  %v359_v4 = vsel %vm358_vm6, %v352_v57, %v357_v1 }
 0x254   :  { %v370_v2 = vrot.slane %v367_v63, 4 }
 0x256   :  { %v372_v3 = vsel %vm326_vm2, %v370_v2, %v371_v0 }
 0x257   :  { %v374_v5 = vsel %vm373_vm7, %v367_v63, %v372_v3  ;;  %v321_v6 = vpop.permute.xlu0 %320 }
 0x258   :  { %v932_v7 = vcombine.low %v359_v4, %v374_v5  ;;  %v933_v8 = vcombine.high %v359_v4, %v374_v5  ;;  %v324_v9 = vrot.slane %v321_v6, 4 }
 0x25a   :  { %517 = vmatprep.subr.bf16.mxu0 %v933_v8  ;;  %v327_v14 = vsel %vm326_vm2, %v324_v9, %v325_v11 }
 0x25b   :  { %518 = vmatpush1.bf16.msra.mxu0 %v932_v7  ;;  %v337_v12 = vpop.permute.xlu0 %336  ;;  %v329_v17 = vsel %vm328_vm8, %v321_v6, %v327_v14 }
 0x25c   :  { %v340_v15 = vrot.slane %v337_v12, 4 }
 0x25e   :  { %v342_v16 = vsel %vm326_vm2, %v340_v15, %v341_v13 }
 0x25f   :  { %v344_v18 = vsel %vm343_vm9, %v337_v12, %v342_v16 }
 0x260   :  { %v930_v19 = vcombine.low %v329_v17, %v344_v18  ;;  %v931_v20 = vcombine.high %v329_v17, %v344_v18 }
 0x262   :  { %519 = vmatprep.subr.bf16.mxu0 %v931_v20 }
 0x263   :  { %520 = vmatpush1.bf16.msra.mxu0 %v930_v19 }
 0x266   :  { %941 = vmatmul.mubr.msk.bf16.vlgmr.msra.gmra.mxu0 %vm494_vm10, %v439_v21 }
 0x326   :  { %v539_v29 = vpop.f32.mrf.mxu0 }
 0x327   :  { %v558_v30 = vmul.f32 %v1260_v27, %v539_v29 }
 0x328   :  { %v541_v31 = vpop.f32.mrf.mxu0 }
 0x329   :  { %v559_v32 = vmul.f32 %v1262_v28, %v541_v31  ;;  %v564_v35 = vmul.f32 %v558_v30, %v539_v29 }
 0x32a   :  { %v543_v33 = vpop.f32.mrf.mxu0 }
 0x32b   :  { %v560_v34 = vadd.f32 %v559_v32, %v558_v30  ;;  %v565_v36 = vmul.f32 %v559_v32, %v541_v31 }
 0x32c   :  { %v544_v37 = vpop.f32.mrf.mxu0 }
 0x32d   :  { %561 = vadd.xlane.f32.xlu0 %v560_v34  ;;  %v566_v38 = vadd.f32 %v565_v36, %v564_v35 }
 0x32f   :  { %567 = vadd.xlane.f32.xlu1 %v566_v38 }
 0x3b6   :  { %v562_v39 = vpop.xlane.xlu0 %561 }
 0x3b7   :  { %v563_v40 = vmul.f32 0.0078125, %v562_v39 }
 0x3b8   :  { %v568_v41 = vpop.xlane.xlu1 %567 }
 0x3b9   :  { %v570_v42 = vmul.f32 %v563_v40, %v563_v40  ;;  %v569_v43 = vmul.f32 0.0078125, %v568_v41 }
 0x3bb   :  { %v571_v44 = vsub.f32 %v569_v43, %v570_v42 }
 0x3bd   :  { %v572_v45 = vadd.f32 1e-05, %v571_v44 }
 0x3bf   :  { %1068 = vrsqrt.f32 %v572_v45 }
 0x3cc   :  { %v1069_v48 = vpop.eup %1068 }
 0x3cd   :  { %v574_v49 = vmul.f32 %v1069_v48, %v1269_v47 }
 0x3cf   :  { %583 = vperm.xlu1 %1045, %v574_v49   ;;  %v575_v50 = vmul.f32 %v574_v49, %v563_v40 }
 0x3d1   :  { %577 = vrot.lane.b32.xlu0 %v575_v50, %s1081_s14 }
 0x3d3   :  { %716 = vrot.lane.b32.xlu1 %v711_v51, %s1077_s10 }
 0x3d7   :  { %688 = vrot.lane.b32.xlu1 %v683_v52, %s1078_s11 }
 0x3db   :  { %702 = vrot.lane.b32.xlu1 %v697_v53, %s1079_s12 }
 0x3df   :  { %674 = vrot.lane.b32.xlu1 %v669_v56, %s1074_s30 }
 0x443   :  { %v578_v54 = vpop.permute.xlu0 %577 }
 0x444   :  { %v580_v55 = vsub.f32 %v1269_v47, %v578_v54 }
 0x446   :  { %590 = vperm.xlu0 %1046, %v580_v55  }
 0x44a   :  { %v584_v57 = vpop.permute.xlu1 %583 }
 0x44b   :  { %v586_v58 = vmul.f32 %v584_v57, %v539_v29  ;;  %v587_v59 = vmul.f32 %v584_v57, %v541_v31 }
 0x44e   :  { %v717_v9 = vpop.permute.xlu1 %716 }
 0x44f   :  { %v719_v15 = vrot.slane %v717_v9, 4 }
 0x452   :  { %v689_v10 = vpop.permute.xlu1 %688 }
 0x453   :  { %v691_v18 = vrot.slane %v689_v10, 4 }
 0x456   :  { %v703_v11 = vpop.permute.xlu1 %702 }
 0x457   :  { %v705_v20 = vrot.slane %v703_v11, 4 }
 0x45a   :  { %v675_v12 = vpop.permute.xlu1 %674 }
 0x45b   :  { %v677_v35 = vrot.slane %v675_v12, 4 }
 0x4c1   :  { %v591_v60 = vpop.permute.xlu0 %590 }
 0x4c2   :  { %v593_v61 = vadd.f32 %v591_v60, %v586_v58  ;;  %v594_v62 = vadd.f32 %v591_v60, %v587_v59 }
 0x4c4   :  { %v595_v63 = vmax.f32 %v593_v61, 0.0  ;;  %v596_v0 = vmax.f32 %v594_v62, 0.0 }
 0x4c6   :  { %v597_v1 = vmul.f32 %v595_v63, %v1260_v27  ;;  %v598_v2 = vmul.f32 %v596_v0, %v1262_v28 }
 0x4c8   :  { %v955_v3 = vpack.c.bf16 %v598_v2, %v597_v1 }
 0x4ca   :  { %609 = vst [vmem:[#allocation3 + $0x4] sm:$0xff] %v955_v3  ;;  %714 = vrot.lane.b32.xlu1 %v955_v3, %s1077_s10  ;;  %686 = vrot.lane.b32.xlu0 %v955_v3, %s1078_s11 }
 0x4ce   :  { %700 = vrot.lane.b32.xlu0 %v955_v3, %s1079_s12 }
 0x4d1   :  { %v639_v4 = vld [vmem:[#allocation3 + $0x8] sm:$0xf]  ;;  %v638_v6 = vld [vmem:[#allocation3] sm:$0xff] }
 0x4d2   :  { %644 = vrot.lane.b32.xlu1 %v639_v4, %s1080_s13  ;;  %672 = vrot.lane.b32.xlu0 %v955_v3, %s1074_s30  ;;  %v653_v5 = vld [vmem:[#allocation3 + $0x8] sm:$0xf] }
 0x4d3   :  { %v611_v7 = vld [vmem:[#allocation3 + $0x8] sm:$0xf] }
 0x4d4   :  { %v625_v8 = vld [vmem:[#allocation3 + $0x8] sm:$0xf] }
 0x4d6   :  { %658 = vrot.lane.b32.xlu1 %v653_v5, %s1081_s14  ;;  %642 = vrot.lane.b32.xlu0 %v638_v6, %s1080_s13 }
 0x4da   :  { %616 = vrot.lane.b32.xlu1 %v611_v7, %s1082_s15  ;;  %656 = vrot.lane.b32.xlu0 %v638_v6, %s1081_s14  ;;  %v724_v7 = vld [vmem:[%s1332_s3 + $0x4] sm:$0xf] }
 0x4de   :  { %630 = vrot.lane.b32.xlu1 %v625_v8, %s1083_s16  ;;  %614 = vrot.lane.b32.xlu0 %v638_v6, %s1082_s15 }
 0x4e2   :  { %628 = vrot.lane.b32.xlu0 %v638_v6, %s1083_s16 }
 0x53c   :  { %v715_v13 = vpop.permute.xlu1 %714  ;;  %v687_v14 = vpop.permute.xlu0 %686 }
 0x53d   :  { %v718_v16 = vrot.slane %v715_v13, 4  ;;  %v690_v17 = vrot.slane %v687_v14, 4 }
 0x53f   :  { %v720_v19 = vsel %vm326_vm2, %v718_v16, %v719_v15  ;;  %v692_v25 = vsel %vm326_vm2, %v690_v17, %v691_v18  ;;  %v1085_v18 = vmov 2  }
 0x540   :  { %v721_v21 = vsel %vm435_vm3, %v715_v13, %v720_v19  ;;  %v701_v22 = vpop.permute.xlu0 %700  ;;  %v693_v31 = vsel %vm405_vm4, %v687_v14, %v692_v25  ;;  %1047 = vset.pattern.permute.xlu1 %v1085_v18 }
 0x541   :  { %v951_v23 = vcombine.low %v721_v21, %v721_v21  ;;  %v952_v24 = vcombine.high %v721_v21, %v721_v21  ;;  %v704_v26 = vrot.slane %v701_v22, 4 }
 0x543   :  { %v706_v29 = vsel %vm326_vm2, %v704_v26, %v705_v20  ;;  %953 = vmatprep.subr.msk.bf16.mxu1 %vm326_vm2, %v952_v24  ;;  %v783_v30 = vsel %vm326_vm2, %v951_v23, 0  ;;  %v1086_v26 = vmov 3  }
 0x544   :  { %v707_v32 = vsel %vm420_vm5, %v701_v22, %v706_v29  ;;  %v645_v33 = vpop.permute.xlu1 %644  ;;  %795 = vmatpush1.bf16.msra.mxu1 %v783_v30  ;;  %v673_v34 = vpop.permute.xlu0 %672  ;;  %1048 = vset.pattern.permute.xlu0 %v1086_v26 }
 0x545   :  { %v949_v36 = vcombine.low %v693_v31, %v707_v32  ;;  %v950_v37 = vcombine.high %v693_v31, %v707_v32  ;;  %v676_v38 = vrot.slane %v673_v34, 4  ;;  %v647_v46 = vrot.slane %v645_v33, 4 }
 0x547   :  { %v678_v39 = vsel %vm326_vm2, %v676_v38, %v677_v35  ;;  %796 = vmatprep.subr.bf16.mxu1 %v950_v37 }
 0x548   :  { %v679_v40 = vsel %vm68_vm0, %v673_v34, %v678_v39  ;;  %v659_v41 = vpop.permute.xlu1 %658  ;;  %797 = vmatpush1.bf16.msra.mxu1 %v949_v36  ;;  %v643_v42 = vpop.permute.xlu0 %642 }
 0x549   :  { %v947_v43 = vcombine.low %v955_v3, %v679_v40  ;;  %v948_v44 = vcombine.high %v955_v3, %v679_v40  ;;  %v646_v45 = vrot.slane %v643_v42, 4  ;;  %v661_v50 = vrot.slane %v659_v41, 4 }
 0x54b   :  { %798 = vmatprep.subr.bf16.mxu1 %v948_v44  ;;  %v648_v51 = vsel %vm326_vm2, %v646_v45, %v647_v46 }
 0x54c   :  { %v617_v48 = vpop.permute.xlu1 %616  ;;  %799 = vmatpush1.bf16.msra.mxu1 %v947_v43  ;;  %v657_v49 = vpop.permute.xlu0 %656  ;;  %v649_v54 = vsel %vm358_vm6, %v643_v42, %v648_v51 }
 0x54d   :  { %v660_v52 = vrot.slane %v657_v49, 4  ;;  %v619_v61 = vrot.slane %v617_v48, 4 }
 0x54f   :  { %v662_v53 = vsel %vm326_vm2, %v660_v52, %v661_v50 }
 0x550   :  { %v663_v55 = vsel %vm373_vm7, %v657_v49, %v662_v53  ;;  %v615_v56 = vpop.permute.xlu0 %614  ;;  %v631_v60 = vpop.permute.xlu1 %630  ;;  %v1087_v49 = vmov 4  }
 0x551   :  { %v945_v57 = vcombine.low %v649_v54, %v663_v55  ;;  %v946_v58 = vcombine.high %v649_v54, %v663_v55  ;;  %v618_v59 = vrot.slane %v615_v56, 4  ;;  %v633_v63 = vrot.slane %v631_v60, 4 }
 0x553   :  { %800 = vmatprep.subr.bf16.mxu1 %v946_v58  ;;  %v620_v0 = vsel %vm326_vm2, %v618_v59, %v619_v61 }
 0x554   :  { %801 = vmatpush1.bf16.msra.mxu1 %v945_v57  ;;  %v629_v62 = vpop.permute.xlu0 %628  ;;  %v621_v3 = vsel %vm328_vm8, %v615_v56, %v620_v0  ;;  %v1088_v57 = vmov 5  }
 0x555   :  { %v632_v1 = vrot.slane %v629_v62, 4 }
 0x557   :  { %v634_v2 = vsel %vm326_vm2, %v632_v1, %v633_v63 }
 0x558   :  { %v635_v4 = vsel %vm343_vm9, %v629_v62, %v634_v2 }
 0x559   :  { %v943_v5 = vcombine.low %v621_v3, %v635_v4  ;;  %v944_v6 = vcombine.high %v621_v3, %v635_v4 }
 0x55b   :  { %802 = vmatprep.subr.bf16.mxu1 %v944_v6 }
 0x55c   :  { %803 = vmatpush1.bf16.msra.mxu1 %v943_v5 }
 0x55f   :  { %954 = vmatmul.mubr.msk.bf16.vlgmr.msra.gmra.mxu1 %vm494_vm10, %v724_v7 }
 0x61f   :  { %v822_v8 = vpop.f32.mrf.mxu1 }
 0x620   :  { %v830_v9 = vmul.f32 %v822_v8, %v1260_v27 }
 0x621   :  { %v824_v10 = vpop.f32.mrf.mxu1 }
 0x622   :  { %v831_v11 = vmul.f32 %v824_v10, %v1262_v28  ;;  %v836_v14 = vmul.f32 %v830_v9, %v822_v8 }
 0x623   :  { %v826_v12 = vpop.f32.mrf.mxu1 }
 0x624   :  { %v832_v13 = vadd.f32 %v831_v11, %v830_v9  ;;  %v837_v15 = vmul.f32 %v831_v11, %v824_v10 }
 0x625   :  { %v827_v16 = vpop.f32.mrf.mxu1 }
 0x626   :  { %833 = vadd.xlane.f32.xlu0 %v832_v13  ;;  %v838_v17 = vadd.f32 %v837_v15, %v836_v14 }
 0x628   :  { %839 = vadd.xlane.f32.xlu1 %v838_v17 }
 0x6af   :  { %v834_v19 = vpop.xlane.xlu0 %833 }
 0x6b0   :  { %v835_v20 = vmul.f32 0.0078125, %v834_v19 }
 0x6b1   :  { %v840_v21 = vpop.xlane.xlu1 %839 }
 0x6b2   :  { %v842_v22 = vmul.f32 %v835_v20, %v835_v20  ;;  %v841_v23 = vmul.f32 0.0078125, %v840_v21 }
 0x6b4   :  { %v843_v24 = vsub.f32 %v841_v23, %v842_v22 }
 0x6b6   :  { %v844_v25 = vadd.f32 1e-05, %v843_v24 }
 0x6b8   :  { %1070 = vrsqrt.f32 %v844_v25 }
 0x6c5   :  { %v1071_v29 = vpop.eup %1070 }
 0x6c6   :  { %v846_v30 = vmul.f32 %v1071_v29, %v1269_v47 }
 0x6c8   :  { %855 = vperm.xlu1 %1047, %v846_v30   ;;  %v847_v31 = vmul.f32 %v846_v30, %v835_v20 }
 0x6ca   :  { %849 = vrot.lane.b32.xlu0 %v847_v31, %s1081_s14 }
 0x6cc   :  { %1050 = vset.pattern.permute.xlu1 %v1088_v57 }
 0x73c   :  { %v850_v32 = vpop.permute.xlu0 %849 }
 0x73d   :  { %v852_v33 = vsub.f32 %v1269_v47, %v850_v32 }
 0x73f   :  { %862 = vperm.xlu0 %1048, %v852_v33  }
 0x743   :  { %v856_v34 = vpop.permute.xlu1 %855  ;;  %1049 = vset.pattern.permute.xlu0 %v1087_v49 }
 0x744   :  { %v858_v35 = vmul.f32 %v856_v34, %v822_v8  ;;  %v859_v36 = vmul.f32 %v856_v34, %v824_v10 }
 0x7ba   :  { %v863_v37 = vpop.permute.xlu0 %862 }
 0x7bb   :  { %v865_v38 = vadd.f32 %v863_v37, %v858_v35  ;;  %v866_v39 = vadd.f32 %v863_v37, %v859_v36 }
 0x7bd   :  { %v867_v40 = vmax.f32 %v865_v38, 0.0  ;;  %v868_v41 = vmax.f32 %v866_v39, 0.0 }
 0x7bf   :  { %v869_v42 = vmul.f32 %v867_v40, %v1260_v27  ;;  %v870_v43 = vmul.f32 %v868_v41, %v1262_v28 }
 0x7c1   :  { %v871_v44 = vadd.f32 %v870_v43, %v869_v42  ;;  %v875_v45 = vmul.f32 %v869_v42, %v867_v40  ;;  %v876_v46 = vmul.f32 %v870_v43, %v868_v41 }
 0x7c3   :  { %872 = vadd.xlane.f32.xlu1 %v871_v44  ;;  %v877_v48 = vadd.f32 %v876_v46, %v875_v45 }
 0x7c5   :  { %878 = vadd.xlane.f32.xlu0 %v877_v48 }
 0x84c   :  { %v873_v50 = vpop.xlane.xlu1 %872 }
 0x84d   :  { %v874_v51 = vmul.f32 0.0078125, %v873_v50 }
 0x84e   :  { %v879_v52 = vpop.xlane.xlu0 %878 }
 0x84f   :  { %v881_v53 = vmul.f32 %v874_v51, %v874_v51  ;;  %v880_v54 = vmul.f32 0.0078125, %v879_v52 }
 0x851   :  { %v882_v55 = vsub.f32 %v880_v54, %v881_v53 }
 0x853   :  { %v883_v56 = vadd.f32 1e-05, %v882_v55 }
 0x855   :  { %1072 = vrsqrt.f32 %v883_v56 }
 0x862   :  { %v1073_v27 = vpop.eup %1072 }
 0x863   :  { %v885_v28 = vmul.f32 %v1073_v27, %v1269_v47 }
 0x865   :  { %894 = vperm.xlu0 %1049, %v885_v28   ;;  %v886_v58 = vmul.f32 %v885_v28, %v874_v51 }
 0x867   :  { %888 = vrot.lane.b32.xlu1 %v886_v58, %s1081_s14 }
 0x869   :  { %1051 = vset.pattern.permute.xlu0 %v1088_v57 }
 0x8d9   :  { %v889_v59 = vpop.permute.xlu1 %888 }
 0x8da   :  { %v891_v60 = vsub.f32 %v1269_v47, %v889_v59 }
 0x8dc   :  { %901 = vperm.xlu1 %1050, %v891_v60  }
 0x8e0   :  { %v895_v61 = vpop.permute.xlu0 %894 }
 0x8e1   :  { %v897_v62 = vmul.f32 %v895_v61, %v867_v40  ;;  %v898_v63 = vmul.f32 %v895_v61, %v868_v41 }
 0x957   :  { %v902_v0 = vpop.permute.xlu1 %901 }
 0x958   :  { %v904_v1 = vadd.f32 %v902_v0, %v897_v62  ;;  %v905_v2 = vadd.f32 %v902_v0, %v898_v63 }
 0x95a   :  { %v906_v3 = vmax.f32 %v904_v1, 0.0  ;;  %v907_v4 = vmax.f32 %v905_v2, 0.0 }
 0x95c   :  { %908 = vst [vmem:[%s1335_s5] sm:$0xff] %v906_v3  ;;  %909 = vst [vmem:[%s1335_s5 + $0x8] sm:$0xff] %v907_v4 }

</bundles_post_ra>
